<compile_context>
chip_gen: v6e
topology: v6e:2x2x1
jax: 0.10.0
libtpu: 0.0.40
codegen_flags: <defaults>
</compile_context>

<pallas_src>
import jax
import jax.numpy as jnp
from jax.experimental import pallas as pl
from jax.experimental.pallas import tpu as pltpu


def _round_up(x, m):
    return ((x + m - 1) // m) * m


def meta_learner_kernel(x_ref, w1_ref, b1_ref, w2_ref, b2_ref, w3_ref, b3_ref, o_ref):
    """3-layer MLP: Linear -> ReLU -> Linear -> ReLU -> Linear.

    MXU matmuls take bf16 operands with f32 accumulation; bias-add / ReLU run in f32
    on the VPU.

    x_ref:  (tb, Fp)   batch tile of concatenated (and lane-padded) base-model outputs, f32
    w*_ref: pre-transposed, zero-padded weights, row-major (in, out), bf16
    b*_ref: (1, out)   biases (f32), broadcast over the batch tile
    o_ref:  (tb, Cp)   ensemble logits (lane-padded to 128), f32
    """
    x = x_ref[...].astype(jnp.bfloat16)
    h = jnp.dot(x, w1_ref[...], preferred_element_type=jnp.float32) + b1_ref[...]
    h = jnp.maximum(h, 0.0)
    h = jnp.dot(h.astype(jnp.bfloat16), w2_ref[...],
                preferred_element_type=jnp.float32) + b2_ref[...]
    h = jnp.maximum(h, 0.0)
    o = jnp.dot(h.astype(jnp.bfloat16), w3_ref[...],
                preferred_element_type=jnp.float32) + b3_ref[...]
    o_ref[...] = o.astype(o_ref.dtype)


def meta_learner(all_features, w1, b1, w2, b2, w3, b3, *, tb=None):
    """all_features: (B, Fx) f32 with Fx >= F (extra columns must be zero padding).
    w1:(H1,F) b1:(H1,) w2:(H2,H1) b2:(H2,) w3:(C,H2) b3:(C,)  (PyTorch nn.Linear layout).
    Returns (B, C) ensemble logits."""
    B, Fx = all_features.shape
    H1, F = w1.shape
    H2 = w2.shape[0]
    C = w3.shape[0]
    assert Fx >= F, "activation width must cover the weight's input width"

    # Lane-dense padded widths (multiples of 128). H1=256 / H2=128 are already aligned.
    Fp = _round_up(max(Fx, F), 128)
    Cp = _round_up(C, 128)

    # Batch tile: multiple of 8 sublanes, capped at 512 rows (well inside v7x's 64 MiB
    # VMEM), and sized so the 1-D parallel grid has >= 2 steps whenever B >= 16 so the
    # two v7x TensorCores both get work.  On v5e/v6e (1 TC) the cap is simply "large".
    if tb is None:
        tb = min(512, max(8, _round_up(pl.cdiv(B, 2), 8)))
    tb = max(8, _round_up(tb, 8))

    Bp = _round_up(B, tb)

    # Pad the batch only when the tile does not divide B (padded rows are independent
    # in an MLP and are sliced off below).  Column-pad activations only if the caller
    # did not already hand us a lane-padded array.
    x = all_features
    if Fx != Fp:
        x = jnp.pad(x, ((0, 0), (0, Fp - Fx)))
    if Bp != B:
        x = jnp.pad(x, ((0, Bp - B), (0, 0)))

    # Glue: transpose weights to (in, out), zero-pad to the lane-dense widths, cast to
    # bf16 (native MXU input on v5e/v6e/v7x).  Biases stay f32 and become 2-D rows.
    w1t = jnp.pad(w1.T, ((0, Fp - F), (0, 0))).astype(jnp.bfloat16)
    w2t = w2.T.astype(jnp.bfloat16)
    w3t = jnp.pad(w3.T, ((0, 0), (0, Cp - C))).astype(jnp.bfloat16)
    b1r = b1.reshape(1, H1).astype(jnp.float32)
    b2r = b2.reshape(1, H2).astype(jnp.float32)
    b3r = jnp.pad(b3, (0, Cp - C)).reshape(1, Cp).astype(jnp.float32)

    grid = (Bp // tb,)

    # Weights counted once (resident across grid steps); activations at padded widths.
    cost = pl.CostEstimate(
        flops=2 * Bp * (Fp * H1 + H1 * H2 + H2 * Cp),
        transcendentals=0,
        bytes_accessed=(4 * Bp * Fp + 4 * Bp * Cp                      # activations in/out (f32)
                        + 2 * (Fp * H1 + H1 * H2 + H2 * Cp)            # bf16 weights, once
                        + 4 * (H1 + H2 + Cp)),                         # f32 biases
    )

    out = pl.pallas_call(
        meta_learner_kernel,
        out_shape=jax.ShapeDtypeStruct((Bp, Cp), all_features.dtype),
        grid_spec=pltpu.PrefetchScalarGridSpec(
            num_scalar_prefetch=0,
            grid=grid,
            in_specs=[
                pl.BlockSpec((tb, Fp), lambda i: (i, 0)),    # batch-tiled activations
                pl.BlockSpec((Fp, H1), lambda i: (0, 0)),    # weights/biases: constant block
                pl.BlockSpec((1, H1), lambda i: (0, 0)),     #   index -> fetched once, stay
                pl.BlockSpec((H1, H2), lambda i: (0, 0)),    #   resident across grid steps
                pl.BlockSpec((1, H2), lambda i: (0, 0)),
                pl.BlockSpec((H2, Cp), lambda i: (0, 0)),
                pl.BlockSpec((1, Cp), lambda i: (0, 0)),
            ],
            out_specs=pl.BlockSpec((tb, Cp), lambda i: (i, 0)),   # lane-dense, unmasked vst
        ),
        compiler_params=pltpu.CompilerParams(
            dimension_semantics=("parallel",),        # shard batch tiles across TCs (v7x)
            vmem_limit_bytes=32 * 1024 * 1024,        # tiles sized far below v7x's 64 MiB
        ),
        cost_estimate=cost,
    )(x, w1t, b1r, w2t, b2r, w3t, b3r)

    return out[:B, :C]


def ensemble_forward(base_features, base_predictions, w1, b1, w2, b2, w3, b3, *, tb=None):
    """EnsembleModel.forward. Base-model outputs are inputs; the Pallas kernel runs the
    neural meta-learner on the concatenated feature vector.

    The lane-padding of the feature dim is folded into the single concat (one extra zero
    block) so there is no separate HBM pad pass over the activations."""
    parts = list(base_features) + list(base_predictions)
    B = parts[0].shape[0]
    F = sum(p.shape[1] for p in parts)
    Fp = _round_up(F, 128)

    concat_parts = parts
    if Fp != F:
        concat_parts = parts + [jnp.zeros((B, Fp - F), dtype=parts[0].dtype)]
    padded = jnp.concatenate(concat_parts, axis=1)     # (B, Fp), lane-dense
    all_features = padded[:, :F]                       # module's 'features' output

    logits = meta_learner(padded, w1, b1, w2, b2, w3, b3, tb=tb)
    return {
        "logits": logits,
        "base_predictions": list(base_predictions),
        "features": all_features,
    }


def ensemble_forward_ref(base_features, base_predictions, w1, b1, w2, b2, w3, b3):
    """Pure-JAX reference mirroring the PyTorch module in eval mode."""
    all_features = jnp.concatenate(list(base_features) + list(base_predictions), axis=1)
    h = jnp.maximum(all_features @ w1.T + b1, 0.0)   # Dropout = identity (eval)
    h = jnp.maximum(h @ w2.T + b2, 0.0)              # Dropout = identity (eval)
    logits = h @ w3.T + b3
    return {
        "logits": logits,
        "base_predictions": list(base_predictions),
        "features": all_features,
    }


if __name__ == "__main__":
    # Small shapes consistent with the module: two base models contributing penultimate
    # features + per-model logits; meta-learner hidden sizes 256/128 are fixed by the module.
    B = 16
    num_classes = 6
    feat_resnet, feat_eff = 48, 32
    H1, H2 = 256, 128
    total_features = feat_resnet + feat_eff + 2 * num_classes   # = 92

    key = jax.random.PRNGKey(0)
    ks = jax.random.split(key, 10)

    # Base-model outputs (the frozen base nets themselves run outside this kernel).
    f_resnet = jax.random.normal(ks[0], (B, feat_resnet), dtype=jnp.float32)
    f_eff = jax.random.normal(ks[1], (B, feat_eff), dtype=jnp.float32)
    p_resnet = jax.random.normal(ks[2], (B, num_classes), dtype=jnp.float32)
    p_eff = jax.random.normal(ks[3], (B, num_classes), dtype=jnp.float32)

    # Meta-learner parameters (nn.Linear layout: (out, in)).
    w1 = jax.random.normal(ks[4], (H1, total_features), dtype=jnp.float32) * 0.05
    b1 = jax.random.normal(ks[5], (H1,), dtype=jnp.float32) * 0.05
    w2 = jax.random.normal(ks[6], (H2, H1), dtype=jnp.float32) * 0.05
    b2 = jax.random.normal(ks[7], (H2,), dtype=jnp.float32) * 0.05
    w3 = jax.random.normal(ks[8], (num_classes, H2), dtype=jnp.float32) * 0.05
    b3 = jax.random.normal(ks[9], (num_classes,), dtype=jnp.float32) * 0.05

    out = ensemble_forward((f_resnet, f_eff), (p_resnet, p_eff), w1, b1, w2, b2, w3, b3)
    jax.block_until_ready(out["logits"])

    ref = ensemble_forward_ref((f_resnet, f_eff), (p_resnet, p_eff), w1, b1, w2, b2, w3, b3)

    assert out["logits"].shape == (B, num_classes)
    assert out["features"].shape == (B, total_features)
    assert jnp.allclose(out["features"], ref["features"]), "features mismatch"
    # bf16 matmul operands (f32 accumulation): loosen tolerance vs. the pure-f32 reference.
    assert jnp.allclose(out["logits"], ref["logits"], atol=2e-2, rtol=2e-2), "logits mismatch"

    print("KERNEL_OK")
</pallas_src>

<mosaic_0001>
module attributes {stable_mosaic.version = 11 : i64} {
  func.func @meta_learner_kernel(%arg0: i32, %arg1: memref<8x128xf32, #tpu.memory_space<vmem>>, %arg2: memref<128x256xbf16, #tpu.memory_space<vmem>>, %arg3: memref<1x256xf32, #tpu.memory_space<vmem>>, %arg4: memref<256x128xbf16, #tpu.memory_space<vmem>>, %arg5: memref<1x128xf32, #tpu.memory_space<vmem>>, %arg6: memref<128x128xbf16, #tpu.memory_space<vmem>>, %arg7: memref<1x128xf32, #tpu.memory_space<vmem>>, %arg8: memref<8x128xf32, #tpu.memory_space<vmem>>) attributes {dimension_semantics = [#tpu.dimension_semantics<parallel>], iteration_bounds = array<i64: 2>, scalar_prefetch = 0 : i64, scratch_operands = 0 : i64, tpu.core_type = #tpu.core_type<tc>, window_params = [{transform_indices = @transform_0, window_bounds = array<i64: 8, 128>}, {pipeline_mode = #tpu.pipeline_mode<synchronous>, transform_indices = @transform_1, window_bounds = array<i64: 128, 256>}, {pipeline_mode = #tpu.pipeline_mode<synchronous>, transform_indices = @transform_2, window_bounds = array<i64: 1, 256>}, {pipeline_mode = #tpu.pipeline_mode<synchronous>, transform_indices = @transform_3, window_bounds = array<i64: 256, 128>}, {pipeline_mode = #tpu.pipeline_mode<synchronous>, transform_indices = @transform_4, window_bounds = array<i64: 1, 128>}, {pipeline_mode = #tpu.pipeline_mode<synchronous>, transform_indices = @transform_5, window_bounds = array<i64: 128, 128>}, {pipeline_mode = #tpu.pipeline_mode<synchronous>, transform_indices = @transform_6, window_bounds = array<i64: 1, 128>}, {transform_indices = @transform_7, window_bounds = array<i64: 8, 128>}]} {
    %c0 = arith.constant 0 : index
    %c0_0 = arith.constant 0 : index
    %0 = vector.load %arg1[%c0, %c0_0] : memref<8x128xf32, #tpu.memory_space<vmem>>, vector<8x128xf32>
    %1 = arith.truncf %0 : vector<8x128xf32> to vector<8x128xbf16>
    %c0_1 = arith.constant 0 : index
    %c0_2 = arith.constant 0 : index
    %2 = vector.load %arg2[%c0_1, %c0_2] : memref<128x256xbf16, #tpu.memory_space<vmem>>, vector<128x256xbf16>
    %cst = arith.constant dense<0.000000e+00> : vector<8x256xf32>
    %3 = tpu.matmul %1, %2, %cst {dimension_numbers = #tpu.dot_dimension_numbers<[1], [0], [0], [1], [0, 0, 1, 1], [], []>} : vector<8x128xbf16>, vector<128x256xbf16>, vector<8x256xf32> -> vector<8x256xf32>
    %c0_3 = arith.constant 0 : index
    %c0_4 = arith.constant 0 : index
    %4 = vector.load %arg3[%c0_3, %c0_4] : memref<1x256xf32, #tpu.memory_space<vmem>>, vector<1x256xf32>
    %5 = vector.broadcast %4 : vector<1x256xf32> to vector<8x256xf32>
    %6 = arith.addf %3, %5 : vector<8x256xf32>
    %cst_5 = arith.constant 0.000000e+00 : f32
    %7 = vector.broadcast %cst_5 : f32 to vector<8x256xf32>
    %8 = arith.maximumf %6, %7 : vector<8x256xf32>
    %9 = arith.truncf %8 : vector<8x256xf32> to vector<8x256xbf16>
    %c0_6 = arith.constant 0 : index
    %c0_7 = arith.constant 0 : index
    %10 = vector.load %arg4[%c0_6, %c0_7] : memref<256x128xbf16, #tpu.memory_space<vmem>>, vector<256x128xbf16>
    %cst_8 = arith.constant dense<0.000000e+00> : vector<8x128xf32>
    %11 = tpu.matmul %9, %10, %cst_8 {dimension_numbers = #tpu.dot_dimension_numbers<[1], [0], [0], [1], [0, 0, 1, 1], [], []>} : vector<8x256xbf16>, vector<256x128xbf16>, vector<8x128xf32> -> vector<8x128xf32>
    %c0_9 = arith.constant 0 : index
    %c0_10 = arith.constant 0 : index
    %12 = vector.load %arg5[%c0_9, %c0_10] : memref<1x128xf32, #tpu.memory_space<vmem>>, vector<1x128xf32>
    %13 = vector.broadcast %12 : vector<1x128xf32> to vector<8x128xf32>
    %14 = arith.addf %11, %13 : vector<8x128xf32>
    %cst_11 = arith.constant 0.000000e+00 : f32
    %15 = vector.broadcast %cst_11 : f32 to vector<8x128xf32>
    %16 = arith.maximumf %14, %15 : vector<8x128xf32>
    %17 = arith.truncf %16 : vector<8x128xf32> to vector<8x128xbf16>
    %c0_12 = arith.constant 0 : index
    %c0_13 = arith.constant 0 : index
    %18 = vector.load %arg6[%c0_12, %c0_13] : memref<128x128xbf16, #tpu.memory_space<vmem>>, vector<128x128xbf16>
    %cst_14 = arith.constant dense<0.000000e+00> : vector<8x128xf32>
    %19 = tpu.matmul %17, %18, %cst_14 {dimension_numbers = #tpu.dot_dimension_numbers<[1], [0], [0], [1], [0, 0, 1, 1], [], []>} : vector<8x128xbf16>, vector<128x128xbf16>, vector<8x128xf32> -> vector<8x128xf32>
    %c0_15 = arith.constant 0 : index
    %c0_16 = arith.constant 0 : index
    %20 = vector.load %arg7[%c0_15, %c0_16] : memref<1x128xf32, #tpu.memory_space<vmem>>, vector<1x128xf32>
    %21 = vector.broadcast %20 : vector<1x128xf32> to vector<8x128xf32>
    %22 = arith.addf %19, %21 : vector<8x128xf32>
    %c0_17 = arith.constant 0 : index
    %c0_18 = arith.constant 0 : index
    %23 = vector.load %arg8[%c0_17, %c0_18] : memref<8x128xf32, #tpu.memory_space<vmem>>, vector<8x128xf32>
    tpu.vector_store %arg8[%c0_17, %c0_18], %22 {strides = array<i32>} : memref<8x128xf32, #tpu.memory_space<vmem>>, vector<8x128xf32>,
    return
  }
  func.func @transform_0(%arg0: i32) -> (i32, i32) {
    %c0_i32 = arith.constant 0 : i32
    %c0_i32_0 = arith.constant 0 : i32
    return %arg0, %c0_i32 : i32, i32
  }
  func.func @transform_1(%arg0: i32) -> (i32, i32) {
    %c0_i32 = arith.constant 0 : i32
    %c0_i32_0 = arith.constant 0 : i32
    %c0_i32_1 = arith.constant 0 : i32
    return %c0_i32, %c0_i32_0 : i32, i32
  }
  func.func @transform_2(%arg0: i32) -> (i32, i32) {
    %c0_i32 = arith.constant 0 : i32
    %c0_i32_0 = arith.constant 0 : i32
    %c0_i32_1 = arith.constant 0 : i32
    return %c0_i32, %c0_i32_0 : i32, i32
  }
  func.func @transform_3(%arg0: i32) -> (i32, i32) {
    %c0_i32 = arith.constant 0 : i32
    %c0_i32_0 = arith.constant 0 : i32
    %c0_i32_1 = arith.constant 0 : i32
    return %c0_i32, %c0_i32_0 : i32, i32
  }
  func.func @transform_4(%arg0: i32) -> (i32, i32) {
    %c0_i32 = arith.constant 0 : i32
    %c0_i32_0 = arith.constant 0 : i32
    %c0_i32_1 = arith.constant 0 : i32
    return %c0_i32, %c0_i32_0 : i32, i32
  }
  func.func @transform_5(%arg0: i32) -> (i32, i32) {
    %c0_i32 = arith.constant 0 : i32
    %c0_i32_0 = arith.constant 0 : i32
    %c0_i32_1 = arith.constant 0 : i32
    return %c0_i32, %c0_i32_0 : i32, i32
  }
  func.func @transform_6(%arg0: i32) -> (i32, i32) {
    %c0_i32 = arith.constant 0 : i32
    %c0_i32_0 = arith.constant 0 : i32
    %c0_i32_1 = arith.constant 0 : i32
    return %c0_i32, %c0_i32_0 : i32, i32
  }
  func.func @transform_7(%arg0: i32) -> (i32, i32) {
    %c0_i32 = arith.constant 0 : i32
    %c0_i32_0 = arith.constant 0 : i32
    return %arg0, %c0_i32 : i32, i32
  }
}

</mosaic_0001>

<bundles_post_ra>
// kernel: tpu_custom_call.1
= control target key start
LH: loop header
LB: loop body
LE: loop exit
PB: predicated region body
PF: predicated region fallthrough
CT: control target
= control target key end

     0   :  { %s1576_s0 = inlined_call_operand.hbm [shape: f32[16,128], index: 0, kind: input, shape index: {}]   ;;  %s1577_s1 = inlined_call_operand.hbm [shape: bf16[128,256], index: 1, kind: input, shape index: {}]   ;;  %s1578_s2 = inlined_call_operand.vmem [shape: f32[1,256], index: 2, kind: input, shape index: {}]   ;;  %s1579_s3 = inlined_call_operand.hbm [shape: bf16[256,128], index: 3, kind: input, shape index: {}]   ;;  %s1580_s4 = inlined_call_operand.vmem [shape: f32[1,128], index: 4, kind: input, shape index: {}]   ;;  %s1581_s5 = inlined_call_operand.hbm [shape: bf16[128,128], index: 5, kind: input, shape index: {}]   ;;  %s1582_s6 = inlined_call_operand.vmem [shape: f32[1,128], index: 6, kind: input, shape index: {}]   ;;  %s1583_s7 = inlined_call_operand.hbm [shape: f32[16,128], index: 7, kind: output, shape index: {}]  }
   0x1   :  { %1588 = sst [smem:[#allocation15_spill]] %s1577_s1 }
   0x2   :  { %1589 = sst [smem:[#allocation16_spill]] %s1579_s3 }
   0x3   :  { %12 = vsyncpa [#allocation3], 0 }
   0x4   :  { %14 = vsyncpa [#allocation3 + $0x1], 0 }
   0x5   :  { %15 = vsyncpa [#allocation6], 0 }
   0x6   :  { %16 = vsyncpa [#allocation9], 0 }
   0x7   :  { %17 = vsyncpa [#allocation4], 0 }
   0x8   :  { %19 = vsyncpa [#allocation4 + $0x1], 0  ;;  %s1371_s24 = smov 0   ;;  %s1373_s25 = smov 0  }
   0x9   :  { %s1375_s26 = smov 0   ;;  %s1377_s27 = smov 0  }
   0xa LB: > { %s1392_s28 = sadd.s32 4294967295, %s1317_s27   ;;  %s896_s29 = sadd.s32 4294967294, %s1317_s27   ;;  %s1317_s27 = sphi %s1377_s27, %s1611_s27   ;;  %s1313_s26 = sphi %s1375_s26, %s1610_s26   ;;  %s1309_s25 = sphi %s1373_s25, %s1609_s25   ;;  %s1305_s24 = sphi %s1371_s24, %s1608_s24  }
   0xb   : > { %p45_p0 = scmp.ne.s32.totalorder %s1309_s25, %s1305_s24  ;;  %p1584_p1 = scmp.eq.s32.totalorder %s1392_s28, 0 }
   0xc   : > { %p201_p3 = scmp.eq.s32.totalorder %s896_s29, 1  ;;  %p897_p5 = scmp.ge.s32.totalorder %s1317_s27, 1 }
   0xd   : > { %p1401_p4 = por %p1584_p1, %p45_p0  ;;  %p208_p7 = scmp.lt.s32.totalorder %s1317_s27, 3 }
   0xe   : > { %p1406_p6 = por %p201_p3, %p45_p0  ;;  %s1319_s10 = smov [#allocation5]  }
   0xf   : > { %s1590_s30 = scalar_select %p1401_p4, 1, 0 }
  0x10   : > { %s1591_s8 = scalar_select %p1406_p6, 1, 0 }
  0x11   : > { %p1411_p8 = pnand %p897_p5, %p208_p7  ;;  %s220_s11 = sshll.u32 %s1319_s10, 4  ;;  %s221_s11 = int_to_ptr.vmem [resolvable:$true] %s220_s11 }
  0x12   : > { %s1320_s13 = smov [#allocation7]   ;;  %s1150_s15 = scalar_lea.vmem %s221_s11, 2048 }
  0x13   : > { %s1592_s9 = scalar_select %p1411_p8, 1, 0 }
  0x14   : > { %p1023_p9 = pneg %p1411_p8  ;;  %s236_s14 = sshll.u32 %s1320_s13, 4  ;;  %s237_s14 = int_to_ptr.vmem [resolvable:$true] %s236_s14 }
  0x15   : > { %p1151_p13 = scmp.ne.s32.totalorder %s221_s11, %s1150_s15  ;;  %p1158_p5 = scmp.lt.s32.totalorder %s221_s11, %s221_s11 }
  0x16   : > { %p1420_p11 = pnand %p1023_p9, %p1584_p1  ;;  %p1159_p7 = scmp.lt.s32.totalorder %s1150_s15, %s1150_s15 }
  0x18   : > { %p1141_p12 = pneg %p1420_p11  ;;  %p1160_p10 = por %p1159_p7, %p1158_p5 }
  0x1a   : > { %p1153_p0 = pnand %p1151_p13, %p1141_p12 }
  0x1c   : > { %p1154_p3 = pneg %p1153_p0 }
  0x1e   : > { %p1161_p9 = pnand %p1160_p10, %p1154_p3 }
  0x20   : > { %1164 = shalt.err (!%p1161_p9)
}
  0x21   : > { %s1321_s16 = smov 128   ;;  %s1322_s17 = smov 8  }
  0x22   : > { %s1594_s1 = sld [smem:[#allocation15_spill]]  ;;  %s1176_s20 = scalar_lea.vmem %s237_s14, 2048 }
  0x23   : > { %p1177_p1 = scmp.ne.s32.totalorder %s237_s14, %s1176_s20  ;;  %p1184_p2 = scmp.lt.s32.totalorder %s237_s14, %s237_s14 }
  0x24   : > { %p1185_p6 = scmp.lt.s32.totalorder %s1176_s20, %s1176_s20 }
  0x25   : > { %p1179_p13 = pnand %p1177_p1, %p1141_p12 }
  0x26   : > { %p1186_p5 = por %p1185_p6, %p1184_p2 }
  0x27   : > { %p1180_p0 = pneg %p1179_p13 }
  0x28   : > { %1026 = dma.hbm_to_vmem [thread:$0]  (!%p1420_p11), %s1594_s1, 2048, %s221_s11, [#allocation6], %s1321_s16, %s1321_s16, %s1322_s17  }
  0x29   : > { %p1187_p10 = pnand %p1186_p5, %p1180_p0 }
  0x2b   : > { %1190 = shalt.err (!%p1187_p10)
}
  0x2c   : > { %s1323_s21 = smov 64   ;;  %s1324_s22 = smov 4  }
  0x2d   : > { %s1595_s3 = sld [smem:[#allocation16_spill]]  ;;  %s1325_s10 = smov [#allocation8]  }
  0x2e   : > { %s252_s11 = sshll.u32 %s1325_s10, 4  ;;  %s1443_s13 = sadd.s32 1, %s1317_s27   ;;  %s253_s11 = int_to_ptr.vmem [resolvable:$true] %s252_s11 }
  0x2f   : > { %s1202_s15 = scalar_lea.vmem %s253_s11, 1024  ;;  %p1210_p3 = scmp.lt.s32.totalorder %s253_s11, %s253_s11 }
  0x30   : > { %p1203_p1 = scmp.ne.s32.totalorder %s253_s11, %s1202_s15  ;;  %p1211_p7 = scmp.lt.s32.totalorder %s1202_s15, %s1202_s15 }
  0x32   : > { %p1205_p2 = pnand %p1203_p1, %p1141_p12  ;;  %p1212_p9 = por %p1211_p7, %p1210_p3 }
  0x33   : > { %1029 = dma.hbm_to_vmem [thread:$0]  (!%p1420_p11), %s1595_s3, 2048, %s237_s14, [#allocation6], %s1323_s21, %s1323_s21, %s1324_s22  }
  0x34   : > { %p1206_p6 = pneg %p1205_p2 }
  0x36   : > { %p1213_p13 = pnand %p1212_p9, %p1206_p6 }
  0x38   : > { %1216 = shalt.err (!%p1213_p13)
}
  0x39   : > { %1032 = dma.hbm_to_vmem [thread:$0]  (!%p1420_p11), %s1581_s5, 1024, %s253_s11, [#allocation9], %s1323_s21, %s1323_s21, %s1324_s22  }
  0x3a   : > { %s29_s17 = ssub.s32 %s1317_s27, %s1443_s13  ;;  %s32_s18 = sadd.s32 1, %s1313_s26 }
  0x3b   : > { %p30_p12 = scmp.eq.s32.totalorder %s29_s17, 0  ;;  %p39_p0 = scmp.ne.s32.totalorder %s1313_s26, %s1309_s25 }
  0x3c   : > { %p40_p5 = scmp.eq.s32.totalorder %s1317_s27, 0  ;;  %p1044_p10 = scmp.lt.s32.totalorder %s1317_s27, 2 }
  0x3d   : > { %s1461_s12 = scalar_select %p30_p12, %s1313_s26, %s32_s18  }
  0x3e   : > { %p41_p1 = por %p40_p5, %p39_p0  ;;  %p1596_p2 = scmp.eq.s32.totalorder %s1392_s28, 1 }
  0x3f   : > { %s269_s20 = sand.u32 1, %s1313_s26   ;;  %s903_s23 = sshll.u32 %s1317_s27, 7 }
  0x40   : > { %p1465_p6 = por %p1596_p2, %p39_p0  ;;  %s902_s29 = sshll.u32 %s269_s20, 3 }
  0x41   : > { %s1474_s21 = scalar_lea.hbm %s1576_s0, %s903_s23  ;;  %s273_s22 = scalar_lea.vmem [#allocation2], %s902_s29 }
  0x42   : > { %s1597_s19 = scalar_select %p1465_p6, 1, 0 }
  0x43   : > { %s280_s11 = sshll.u32 %s273_s22, 4  ;;  %p1476_p11 = pnand %p1044_p10, %p41_p1  ;;  %s281_s11 = int_to_ptr.vmem [resolvable:$true] %s280_s11 }
  0x44   : > { %s270_s14 = scalar_lea.sflag [#allocation3], %s269_s20  ;;  %s1217_s17 = scalar_lea.hbm %s1474_s21, 128 }
  0x45   : > { %p1218_p3 = scmp.ne.s32.totalorder %s1474_s21, %s1217_s17  ;;  %p1219_p7 = pneg %p1476_p11 }
  0x46   : > { %s1222_s10 = scalar_lea.hbm %s1576_s0, 256  ;;  %p1223_p12 = scmp.lt.s32.totalorder %s1474_s21, %s1576_s0 }
  0x47   : > { %p1220_p9 = pnand %p1219_p7, %p1218_p3  ;;  %p1224_p0 = scmp.lt.s32.totalorder %s1222_s10, %s1217_s17 }
  0x49   : > { %p1221_p13 = pneg %p1220_p9  ;;  %p1225_p5 = por %p1224_p0, %p1223_p12 }
  0x4b   : > { %p1226_p10 = pnand %p1225_p5, %p1221_p13 }
  0x4d   : > { %1229 = shalt.err (!%p1226_p10)
}
  0x4e   : > { %s1230_s22 = scalar_lea.vmem %s281_s11, 128  ;;  %s1326_s20 = smov [#allocation2]  }
  0x4f   : > { %p1231_p1 = scmp.ne.s32.totalorder %s281_s11, %s1230_s22  ;;  %s1235_s1 = sshll.u32 %s1326_s20, 4  ;;  %s1236_s1 = int_to_ptr.vmem [resolvable:$false] %s1235_s1 }
  0x50   : > { %s1237_s3 = scalar_lea.vmem %s1236_s1, 256  ;;  %p1238_p3 = scmp.lt.s32.totalorder %s281_s11, %s1236_s1 }
  0x51   : > { %p1233_p2 = pnand %p1231_p1, %p1219_p7  ;;  %p1239_p9 = scmp.lt.s32.totalorder %s1237_s3, %s1230_s22 }
  0x53   : > { %p1234_p6 = pneg %p1233_p2  ;;  %p1240_p4 = por %p1239_p9, %p1238_p3 }
  0x55   : > { %p1241_p8 = pnand %p1240_p4, %p1234_p6 }
  0x57   : > { %1244 = shalt.err (!%p1241_p8)
}
  0x58   : > { %1036 = dma.hbm_to_vmem [thread:$0]  (!%p1476_p11), %s1474_s21, 128, %s281_s11, %s270_s14  }
  0x59   : > { %p1599_p13 = scmp.ne.s32.totalorder %s1592_s9, 0 }
  0x5a   : > { %s1497_s17 = sand.u32 (!%p1599_p13), 1, %s1309_s25   ;;  %p1600_p4 = scmp.ne.s32.totalorder (!%p1599_p13), %s1590_s30, 0 }
  0x5b   : > { %289 = sbr.rel (%p1599_p13) target bundleno = 751 (0x2ef), region = 48  ;;  %s905_s18 = sshll.u32 (!%p1599_p13), %s1497_s17, 3 }
  0x5c   : > { %s292_s1 = scalar_lea.sflag (!%p1599_p13), [#allocation3], %s1497_s17  ;;  %s1503_s3 = scalar_lea.vmem (!%p1599_p13), [#allocation2], %s905_s18 }
  0x60   : > { %1288 = dma.done.wait (%p1600_p4), %s292_s1, 128  }
  0x61   : > { %1290 = vsyncadd (%p1600_p4), %s292_s1, 4294967168  ;;  %p1601_p8 = scmp.eq.s32.totalorder %s1392_s28, 0 }
  0x63   : > { %1292 = dma.done.wait (%p1601_p8), [#allocation6], 4096   ;;  %p1602_p6 = pmov %p1601_p8 }
  0x65   : > { %1294 = vsyncadd (%p1602_p6), [#allocation6], 4294963200  ;;  %p1603_p11 = pmov %p1602_p6 }
  0x66   : > { %p1604_p7 = pmov %p1602_p6 }
  0x67   : > { %1296 = dma.done.wait (%p1603_p11), [#allocation9], 1024  }
  0x68   : > { %1298 = vsyncadd (%p1604_p7), [#allocation9], 4294966272  ;;  %v1327_v0 = vmov 0   ;;  %v1091_v1 = vld [vmem:[#allocation5 + $0x74] ss:$8 sps:$4 sm:$0xff]   ;;  %v1119_v15 = vld [vmem:[#allocation7 + $0x68] sm:$0xff]   ;;  %v359_v41 = vlaneseq }
  0x69   : > { %481 = vmatprep.mubr.bf16.mxu0 %v1327_v0  ;;  %v1093_v2 = vld [vmem:[#allocation5 + $0x70] ss:$8 sps:$4 sm:$0xff]   ;;  %449 = vmatprep.subr.bf16.mxu0 %v1091_v1  ;;  %v1094_v3 = vld [vmem:[#allocation5 + $0x64] ss:$8 sps:$4 sm:$0xff]   ;;  %v1096_v4 = vld [vmem:[#allocation5 + $0x60] ss:$8 sps:$4 sm:$0xff]  }
  0x6a   : > { %450 = vmatpush1.bf16.msra.mxu0 %v1093_v2  ;;  %v1097_v5 = vld [vmem:[#allocation5 + $0x54] ss:$8 sps:$4 sm:$0xff]   ;;  %v1099_v6 = vld [vmem:[#allocation5 + $0x50] ss:$8 sps:$4 sm:$0xff]   ;;  %v1100_v7 = vld [vmem:[#allocation5 + $0x44] ss:$8 sps:$4 sm:$0xff]  }
  0x6b   : > { %451 = vmatprep.subr.bf16.mxu0 %v1094_v3  ;;  %v1102_v8 = vld [vmem:[#allocation5 + $0x40] ss:$8 sps:$4 sm:$0xff]   ;;  %v1103_v9 = vld [vmem:[#allocation5 + $0x34] ss:$8 sps:$4 sm:$0xff]   ;;  %v1105_v12 = vld [vmem:[#allocation5 + $0x30] ss:$8 sps:$4 sm:$0xff]  }
  0x6c   : > { %v1115_v10 = vld [vmem:[#allocation7 + $0x78] sm:$0xff]   ;;  %v1117_v13 = vld [vmem:[#allocation7 + $0x70] sm:$0xff]   ;;  %v1106_v16 = vld [vmem:[#allocation5 + $0x24] ss:$8 sps:$4 sm:$0xff]   ;;  %v1328_v36 = vmov 0.0   ;;  %v360_v42 = vshrl.u32 %v359_v41, 7 }
  0x6d   : > { %v1116_v11 = vld [vmem:[#allocation7 + $0x38] sm:$0xff]   ;;  %956 = vmatprep.subr.bf16.mxu1 %v1115_v10  ;;  %v1118_v14 = vld [vmem:[#allocation7 + $0x30] sm:$0xff]   ;;  %v1108_v17 = vld [vmem:[#allocation5 + $0x20] ss:$8 sps:$4 sm:$0xff]   ;;  %vm1329_vm0 = vmmov 0   ;;  %s953_s23 = sshll.u32 %s1392_s28, 7 }
  0x6e   : > { %452 = vmatpush1.bf16.msra.mxu0 %v1096_v4  ;;  %957 = vmatpush3.bf16.msra.mxu1 %v1116_v11  ;;  %v1120_v18 = vld [vmem:[#allocation7 + $0x28] sm:$0xff]   ;;  %v1121_v19 = vld [vmem:[#allocation7 + $0x60] sm:$0xff]   ;;  %v1109_v20 = vld [vmem:[#allocation5 + $0x14] ss:$8 sps:$4 sm:$0xff]   ;;  %v361_v43 = vsub.s32 0, %v360_v42  ;;  %v365_v45 = vsub.s32 1, %v360_v42  ;;  %s1533_s20 = scalar_lea.hbm %s1583_s7, %s953_s23 }
  0x6f   : > { %453 = vmatprep.subr.bf16.mxu0 %v1097_v5  ;;  %958 = vmatprep.subr.bf16.mxu1 %v1117_v13  ;;  %v1111_v21 = vld [vmem:[#allocation5 + $0x10] ss:$8 sps:$4 sm:$0xff]   ;;  %v1112_v22 = vld [vmem:[#allocation5 + $0x4] ss:$8 sps:$4 sm:$0xff]   ;;  %v1114_v26 = vld [vmem:[#allocation5] ss:$8 sps:$4 sm:$0xff]  }
  0x70   : > { %v1122_v23 = vld [vmem:[#allocation7 + $0x20] sm:$0xff]   ;;  %v1123_v24 = vld [vmem:[#allocation7 + $0x58] sm:$0xff]   ;;  %v1125_v28 = vld [vmem:[#allocation7 + $0x50] sm:$0xff]   ;;  %s337_s10 = scalar_lea.vmem [#allocation10], %s905_s18  ;;  %s784_s1 = scalar_lea.sflag [#allocation4], %s1497_s17 }
  0x71   : > { %v1124_v25 = vld [vmem:[#allocation7 + $0x18] sm:$0xff]   ;;  %v1126_v29 = vld [vmem:[#allocation7 + $0x10] sm:$0xff]   ;;  %v1127_v31 = vld [vmem:[#allocation7 + $0x48] sm:$0xff]   ;;  %s797_s15 = sshll.u32 %s337_s10, 4  ;;  %p1605_p0 = scmp.ne.s32.totalorder %s1597_s19, 0  ;;  %s1535_s15 = int_to_ptr.vmem [resolvable:$true] %s797_s15 }
  0x72   : > { %454 = vmatpush1.bf16.msra.mxu0 %v1099_v6  ;;  %959 = vmatpush3.bf16.msra.mxu1 %v1118_v14  ;;  %v339_v27 = vld [vmem:[%s1503_s3] sm:$0xff]  ;;  %v1128_v32 = vld [vmem:[#allocation7 + $0x8] sm:$0xff]   ;;  %v1129_v33 = vld [vmem:[#allocation7 + $0x40] sm:$0xff]   ;;  %s1245_s28 = scalar_lea.vmem %s1535_s15, 128  ;;  %s1330_s18 = smov [#allocation10]  }
  0x73   : > { %455 = vmatprep.subr.bf16.mxu0 %v1100_v7  ;;  %960 = vmatprep.subr.bf16.mxu1 %v1119_v15  ;;  %v340_v30 = vpack.c.bf16 %v339_v27, %v339_v27  ;;  %v1130_v34 = vld [vmem:[#allocation7] sm:$0xff]   ;;  %v1131_v35 = vld [vmem:[#allocation8 + $0x38] sm:$0xff]   ;;  %v1132_v37 = vld [vmem:[#allocation8 + $0x30] sm:$0xff]   ;;  %p1246_p12 = scmp.ne.s32.totalorder %s1535_s15, %s1245_s28  ;;  %s1249_s3 = sshll.u32 %s1330_s18, 4  ;;  %s1250_s3 = int_to_ptr.vmem [resolvable:$false] %s1249_s3 }
  0x74   : > { %v1133_v38 = vld [vmem:[#allocation8 + $0x28] sm:$0xff]   ;;  %v1134_v39 = vld [vmem:[#allocation8 + $0x20] sm:$0xff]   ;;  %v1135_v40 = vld [vmem:[#allocation8 + $0x18] sm:$0xff]   ;;  %s1251_s30 = scalar_lea.vmem %s1250_s3, 256  ;;  %p1252_p1 = scmp.lt.s32.totalorder %s1535_s15, %s1250_s3 }
  0x75   : > { %v357_v44 = vld [vmem:[%s1578_s2] sm:$0x3]  ;;  %v1137_v59 = vld [vmem:[#allocation8 + $0x8] sm:$0xff]   ;;  %v1138_v60 = vld [vmem:[#allocation8] sm:$0xff]   ;;  %p1247_p5 = pnand %p1246_p12, %p1605_p0  ;;  %p1253_p2 = scmp.lt.s32.totalorder %s1251_s30, %s1245_s28 }
  0x76   : > { %456 = vmatpush1.bf16.msra.mxu0 %v1102_v8  ;;  %961 = vmatpush3.bf16.msra.mxu1 %v1120_v18  ;;  %v362_v46 = vrot.slane %v357_v44, %v361_v43  ;;  %v366_v47 = vrot.slane %v357_v44, %v365_v45  ;;  %v1136_v58 = vld [vmem:[#allocation8 + $0x10] sm:$0xff]  }
  0x77   : > { %457 = vmatprep.subr.bf16.mxu0 %v1103_v9  ;;  %962 = vmatprep.subr.bf16.mxu1 %v1121_v19  ;;  %v926_v62 = vld [vmem:[%s1580_s4] ss:$0 sm:$0xff]  ;;  %p1248_p10 = pneg %p1247_p5  ;;  %p1254_p3 = por %p1253_p2, %p1252_p1 }
  0x78   : > { %v943_v6 = vld [vmem:[%s1582_s6] ss:$0 sm:$0xff] }
  0x79   : > { %p1255_p9 = pnand %p1254_p3, %p1248_p10 }
  0x7a   : > { %458 = vmatpush1.bf16.msra.mxu0 %v1105_v12  ;;  %963 = vmatpush3.bf16.msra.mxu1 %v1122_v23 }
  0x7b   : > { %459 = vmatprep.subr.bf16.mxu0 %v1106_v16  ;;  %964 = vmatprep.subr.bf16.mxu1 %v1123_v24 }
  0x7e   : > { %460 = vmatpush1.bf16.msra.mxu0 %v1108_v17  ;;  %965 = vmatpush3.bf16.msra.mxu1 %v1124_v25 }
  0x7f   : > { %461 = vmatprep.subr.bf16.mxu0 %v1109_v20  ;;  %966 = vmatprep.subr.bf16.mxu1 %v1125_v28 }
  0x82   : > { %462 = vmatpush1.bf16.msra.mxu0 %v1111_v21  ;;  %967 = vmatpush3.bf16.msra.mxu1 %v1126_v29 }
  0x83   : > { %463 = vmatprep.subr.bf16.mxu0 %v1112_v22  ;;  %968 = vmatprep.subr.bf16.mxu1 %v1127_v31 }
  0x86   : > { %464 = vmatpush1.bf16.msra.mxu0 %v1114_v26  ;;  %969 = vmatpush3.bf16.msra.mxu1 %v1128_v32 }
  0x87   : > { %970 = vmatprep.subr.bf16.mxu1 %v1129_v33  ;;  %987 = vmatprep.subr.bf16.mxu0 %v1328_v36 }
  0x89   : > { %482 = vmatmul.mubr.bf16.vlgmr.msra.gmra.mxu0 %v340_v30 }
  0x8a   : > { %971 = vmatpush3.bf16.msra.mxu1 %v1130_v34  ;;  %988 = vmatpush3.bf16.msra.mxu0 %v1131_v35 }
  0x8b   : > { %989 = vmatprep.subr.bf16.mxu0 %v1328_v36  ;;  %1003 = vmatprep.mubr.msk.bf16.mxu0 %vm1329_vm0, %v1328_v36 }
  0x8e   : > { %990 = vmatpush3.bf16.msra.mxu0 %v1132_v37 }
  0x8f   : > { %991 = vmatprep.subr.bf16.mxu0 %v1328_v36 }
  0x92   : > { %992 = vmatpush3.bf16.msra.mxu0 %v1133_v38 }
  0x93   : > { %993 = vmatprep.subr.bf16.mxu0 %v1328_v36 }
  0x96   : > { %994 = vmatpush3.bf16.msra.mxu0 %v1134_v39 }
  0x97   : > { %995 = vmatprep.subr.bf16.mxu0 %v1328_v36 }
  0x9a   : > { %996 = vmatpush3.bf16.msra.mxu0 %v1135_v40 }
  0x9b   : > { %997 = vmatprep.subr.bf16.mxu0 %v1328_v36 }
  0x9e   : > { %998 = vmatpush3.bf16.msra.mxu0 %v1136_v58 }
  0x9f   : > { %999 = vmatprep.subr.bf16.mxu0 %v1328_v36 }
  0xa2   : > { %1000 = vmatpush3.bf16.msra.mxu0 %v1137_v59 }
  0xa3   : > { %1001 = vmatprep.subr.bf16.mxu0 %v1328_v36 }
  0xa6   : > { %1002 = vmatpush3.bf16.msra.mxu0 %v1138_v60 }
 0x149   : > { %v483_v48 = vpop.f32.mrf.mxu0 }
 0x14a   : > { %v484_v49 = vadd.f32 %v483_v48, %v362_v46 }
 0x14b   : > { %v485_v50 = vpop.f32.mrf.mxu0 }
 0x14c   : > { %v486_v51 = vadd.f32 %v485_v50, %v366_v47  ;;  %v490_v52 = vmax.f32 %v484_v49, 0.0 }
 0x14d   : > { %v487_v53 = vpop.f32.mrf.mxu0 }
 0x14e   : > { %v491_v54 = vmax.f32 %v486_v51, 0.0  ;;  %v492_v57 = vpack.c.bf16 %v490_v52, %v490_v52 }
 0x14f   : > { %v488_v55 = vpop.f32.mrf.mxu0 }
 0x150   : > { %v493_v56 = vpack.c.bf16 %v491_v54, %v491_v54 }
 0x152   : > { %661 = vmatprep.mubr.bf16.mxu1 %v493_v56 }
 0x153   : > { %662 = vmatmul.mubr.bf16.vlgmr.msra.gmra.mxu1 %v492_v57 }
 0x213   : > { %v972_v61 = vpop.f32.mrf.mxu1 }
 0x215   : > { %v973_v63 = vpop.f32.mrf.mxu1 }
 0x216   : > { %v974_v0 = vadd.f32 %v973_v63, %v972_v61 }
 0x217   : > { %v975_v1 = vpop.f32.mrf.mxu1 }
 0x218   : > { %v664_v2 = vadd.f32 %v974_v0, %v926_v62 }
 0x219   : > { %v976_v3 = vpop.f32.mrf.mxu1 }
 0x21a   : > { %v669_v4 = vmax.f32 %v664_v2, 0.0 }
 0x21c   : > { %v670_v5 = vpack.c.bf16 %v669_v4, %v669_v4 }
 0x21e   : > { %1004 = vmatmul.mubr.bf16.vlgmr.msra.gmra.mxu0 %v670_v5 }
 0x2de   : > { %v776_v7 = vpop.f32.mrf.mxu0 }
 0x2df   : > { %v777_v8 = vadd.f32 %v943_v6, %v776_v7 }
 0x2e0   : > { %v1005_v9 = vpop.f32.mrf.mxu0 }
 0x2e1   : > { %782 = vst [vmem:[%s337_s10] sm:$0xff] %v777_v8 }
 0x2e2   : > { %v779_v10 = vpop.f32.mrf.mxu0 }
 0x2e3   : > { %1258 = shalt.err (!%p1255_p9)
}
 0x2e4   : > { %s1259_s9 = scalar_lea.hbm %s1533_s20, 128  ;;  %s1263_s11 = scalar_lea.hbm %s1583_s7, 256 }
 0x2e5   : > { %p1260_p13 = scmp.ne.s32.totalorder %s1533_s20, %s1259_s9  ;;  %p1264_p6 = scmp.lt.s32.totalorder %s1533_s20, %s1583_s7 }
 0x2e6   : > { %p1265_p11 = scmp.lt.s32.totalorder %s1263_s11, %s1259_s9 }
 0x2e7   : > { %p1261_p4 = pnand %p1260_p13, %p1605_p0 }
 0x2e8   : > { %p1266_p7 = por %p1265_p11, %p1264_p6 }
 0x2e9   : > { %p1262_p8 = pneg %p1261_p4 }
 0x2eb   : > { %p1267_p12 = pnand %p1266_p7, %p1262_p8 }
 0x2ed   : > { %1270 = shalt.err (!%p1267_p12)
}
 0x2ee   : > { %1021 = dma.vmem_to_hbm [thread:$0]  (%p1605_p0), %s1535_s15, 128, %s1533_s20, %s784_s1   ;;  %v1006_v11 = vpop.f32.mrf.mxu0 }
 0x2ef PF: > { %s809_s23 = sand.u32 1, %s1305_s24   ;;  %p1606_p5 = scmp.ne.s32.totalorder %s1591_s8, 0 }
 0x2f0   : > { %p1607_p10 = scmp.ge.s32.totalorder %s1317_s27, 2  ;;  %s810_s10 = scalar_lea.sflag [#allocation4], %s809_s23 }
 0x2f2   : > { %p1038_p1 = pnand %p1607_p10, %p1606_p5 }
 0x2f4   : > { %p1039_p2 = pneg %p1038_p1 }
 0x2f6   : > { %1300 = dma.done.wait (%p1039_p2), %s810_s10, 128  }
 0x2f7   : > { %1302 = vsyncadd (%p1039_p2), %s810_s10, 4294967168  ;;  %p22_p3 = scmp.ge.s32.totalorder %s1443_s13, 4   ;;  %s1608_s24 = smov %s1309_s25 }
 0x2f8   : > { %s1609_s25 = smov %s1313_s26  ;;  %s1610_s26 = smov %s1461_s12 }
 0x2f9   : > { %s1611_s27 = smov %s1443_s13  ;;  %24 = sbr.rel (!%p22_p3) target bundleno = 10 (0xa), region = 105 }
 0x2fe   :  { %815 = vsyncpa [#allocation3], 1 }
 0x2ff   :  { %817 = vsyncpa [#allocation3 + $0x1], 1 }
 0x300   :  { %818 = vsyncpa [#allocation6], 1 }
 0x301   :  { %819 = vsyncpa [#allocation9], 1 }
 0x302   :  { %820 = vsyncpa [#allocation4], 1 }
 0x303   :  { %822 = vsyncpa [#allocation4 + $0x1], 1 }

</bundles_post_ra>
